<compile_context>
chip_gen: v7x
topology: tpu7x:2x2x1
jax: 0.10.0
libtpu: 0.0.40
codegen_flags: <defaults>
</compile_context>

<pallas_src>
import functools

import jax
import jax.numpy as jnp
from jax import lax
from jax.experimental import pallas as pl
from jax.experimental.pallas import tpu as pltpu


def _round_up(n, m):
    return ((n + m - 1) // m) * m


def _vmem_capacity_bytes():
    """Per-core VMEM capacity; conservative default if the query is unavailable."""
    try:
        return int(pltpu.get_tpu_info().vmem_capacity_bytes)
    except Exception:
        return 64 << 20  # smallest per-core VMEM among supported chips (v7x)


def _ctrnn_recurrence_kernel(pre_ref, w_hbm_ref, out_ref,
                             w_vmem, h_scratch, w_sem, *, t_block):
    """t_block timesteps of the serial recurrence  h <- relu(pre[t] + h @ W_eff).

    pre_ref  : (t_block, B_pad, H_pad) f32   alpha*(x@W_in + b_in + b_h), precomputed
    w_hbm_ref: (H_pad, H_pad)                W_eff = alpha*W_h + (1-alpha)*I   (HBM)
    out_ref  : (t_block, B_pad, H_pad)       stacked hidden states (x.dtype)
    w_vmem   : VMEM copy of W_eff, resident once for the whole grid
    h_scratch: (B_pad, H_pad) f32            hidden-state carry across grid steps
    w_sem    : DMA semaphore for the one-time weight copy
    """
    blk = pl.program_id(0)

    @pl.when(blk == 0)
    def _():
        # Single-residency copy of the loop-invariant recurrent weight
        # (no double-buffering), plus init_hidden() = zeros.
        cp = pltpu.make_async_copy(w_hbm_ref, w_vmem, w_sem)
        cp.start()
        cp.wait()
        h_scratch[...] = jnp.zeros_like(h_scratch)

    w_eff = w_vmem[...]  # loaded once per grid step

    def step(i, h):
        # Leak term is folded into W_eff -> one MXU dot + add + relu per step.
        pre = pre_ref[i] + jnp.dot(h.astype(w_eff.dtype), w_eff,
                                   preferred_element_type=jnp.float32)
        h_new = jnp.maximum(pre, 0.0)
        out_ref[i] = h_new.astype(out_ref.dtype)
        return h_new

    unroll = True if t_block <= 8 else 8  # bound code size / vreg pressure
    h_scratch[...] = lax.fori_loop(0, t_block, step, h_scratch[...],
                                   unroll=unroll)


def ctrnn_forward(x, w_in, b_in, w_h, b_h, *, dt=None, tau=100.0,
                  t_block=None, w_dtype=None):
    """x: (seq, batch, input_size); w_in: (I, H); w_h: (H, H); biases: (1, H) or (H,).

    Returns (output, hidden): output (seq, batch, H) in x.dtype, hidden = output[-1].
    """
    seq_len, batch, input_size = x.shape
    hidden_size = w_in.shape[1]
    out_dtype = x.dtype

    alpha = 1.0 if dt is None else float(dt) / float(tau)

    # ---- Padded, lane-dense shapes ------------------------------------------
    b_pad = _round_up(max(batch, 1), 8)      # sublane multiple
    h_pad = _round_up(hidden_size, 128)      # lane multiple

    # ---- Effective recurrent weight: leak folded in, then zero-padded --------
    w_eff = (w_h.astype(jnp.float32) * alpha
             + (1.0 - alpha) * jnp.eye(hidden_size, dtype=jnp.float32))
    if w_dtype is None:
        # f32 residency is cheap up to ~1K hidden; beyond that bf16 halves the
        # resident footprint (matters on v7x's 64 MiB VMEM) and runs faster on MXU.
        w_dtype = jnp.bfloat16 if h_pad >= 2048 else jnp.float32
    w_eff_p = jnp.pad(w_eff, ((0, h_pad - hidden_size),
                              (0, h_pad - hidden_size))).astype(w_dtype)

    # ---- VMEM-budgeted time block & limit ------------------------------------
    cap = _vmem_capacity_bytes()
    w_bytes = h_pad * h_pad * jnp.dtype(w_dtype).itemsize
    out_itemsize = jnp.dtype(out_dtype).itemsize
    # Double-buffered input block (f32) + double-buffered output block per timestep.
    per_t = 2 * b_pad * h_pad * 4 + 2 * b_pad * h_pad * out_itemsize
    budget = int(0.85 * cap) - w_bytes - b_pad * h_pad * 4 - (2 << 20)
    auto_t = max(1, budget // per_t) if budget > 0 else 1
    if t_block is None:
        t_block = min(auto_t, 32, seq_len)
    t_block = max(1, min(int(t_block), seq_len))
    t_pad = _round_up(seq_len, t_block)

    vmem_limit = int(min(
        max(t_block * per_t + w_bytes + b_pad * h_pad * 4 + (2 << 20), 16 << 20),
        int(0.9 * cap)))

    # ---- Hoisted input projection, produced directly in padded layout --------
    x_p = jnp.pad(x.astype(jnp.float32),
                  ((0, t_pad - seq_len), (0, b_pad - batch), (0, 0)))
    w_in_a = jnp.pad(w_in.astype(jnp.float32) * alpha,
                     ((0, 0), (0, h_pad - hidden_size)))
    bias_a = jnp.pad((b_in.astype(jnp.float32)
                      + b_h.astype(jnp.float32)).reshape(1, hidden_size) * alpha,
                     ((0, 0), (0, h_pad - hidden_size)))
    pre_p = (x_p.reshape(t_pad * b_pad, input_size) @ w_in_a
             ).reshape(t_pad, b_pad, h_pad) + bias_a        # (T_pad, B_pad, H_pad) f32
    # Zero padding keeps padded hidden lanes exactly zero through the recurrence.

    kernel = functools.partial(_ctrnn_recurrence_kernel, t_block=t_block)

    grid_spec = pltpu.PrefetchScalarGridSpec(
        num_scalar_prefetch=0,
        grid=(t_pad // t_block,),
        in_specs=[
            pl.BlockSpec((t_block, b_pad, h_pad), lambda b: (b, 0, 0)),  # pre_in block
            pl.BlockSpec(memory_space=pl.ANY),                           # W_eff (HBM)
        ],
        out_specs=pl.BlockSpec((t_block, b_pad, h_pad), lambda b: (b, 0, 0)),
        scratch_shapes=[
            pltpu.VMEM((h_pad, h_pad), w_dtype),      # resident weight (1x, manual DMA)
            pltpu.VMEM((b_pad, h_pad), jnp.float32),  # hidden-state carry
            pltpu.SemaphoreType.DMA(()),              # weight-copy semaphore
        ],
    )

    out_p = pl.pallas_call(
        kernel,
        out_shape=jax.ShapeDtypeStruct((t_pad, b_pad, h_pad), out_dtype),
        grid_spec=grid_spec,
        compiler_params=pltpu.CompilerParams(
            dimension_semantics=("arbitrary",),   # serial recurrence over time
            vmem_limit_bytes=vmem_limit),
    )(pre_p, w_eff_p)

    output = out_p[:seq_len, :batch, :hidden_size]
    hidden = output[-1]
    return output, hidden


def ctrnn_reference(x, w_in, b_in, w_h, b_h, *, dt=None, tau=100.0):
    """Pure-JAX reference mirroring the PyTorch forward exactly."""
    alpha = 1.0 if dt is None else float(dt) / float(tau)
    oneminusalpha = 1.0 - alpha
    seq_len, batch, _ = x.shape
    hidden = jnp.zeros((batch, w_in.shape[1]), dtype=jnp.float32)
    outs = []
    for t in range(seq_len):
        pre = x[t] @ w_in + b_in + hidden @ w_h + b_h
        hidden = jnp.maximum(hidden * oneminusalpha + pre * alpha, 0.0)
        outs.append(hidden)
    return jnp.stack(outs, axis=0), hidden


if __name__ == "__main__":
    # Small shapes consistent with (seq_len, batch, input_size) / hidden_size.
    seq_len, batch, input_size, hidden_size = 8, 2, 4, 32

    key = jax.random.PRNGKey(0)
    k_x, k_win, k_bin, k_bh = jax.random.split(key, 4)

    x = jax.random.normal(k_x, (seq_len, batch, input_size), dtype=jnp.float32)

    # input2h: default nn.Linear init, pre-transposed to (I, H).
    bound_in = 1.0 / (input_size ** 0.5)
    w_in = jax.random.uniform(k_win, (input_size, hidden_size),
                              minval=-bound_in, maxval=bound_in, dtype=jnp.float32)
    b_in = jax.random.uniform(k_bin, (1, hidden_size),
                              minval=-bound_in, maxval=bound_in, dtype=jnp.float32)

    # h2h: reset_parameters() sets weight = 0.5 * I (symmetric); default bias init.
    w_h = 0.5 * jnp.eye(hidden_size, dtype=jnp.float32)
    bound_h = 1.0 / (hidden_size ** 0.5)
    b_h = jax.random.uniform(k_bh, (1, hidden_size),
                             minval=-bound_h, maxval=bound_h, dtype=jnp.float32)

    for dt in (None, 20.0):   # exercise both alpha = 1 and alpha = dt/tau paths
        out, h_final = ctrnn_forward(x, w_in, b_in, w_h, b_h, dt=dt)
        out = jax.block_until_ready(out)
        h_final = jax.block_until_ready(h_final)

        out_ref, h_ref = ctrnn_reference(x, w_in, b_in, w_h, b_h, dt=dt)
        assert out.shape == (seq_len, batch, hidden_size)
        assert h_final.shape == (batch, hidden_size)
        assert jnp.allclose(out, out_ref, atol=1e-4, rtol=1e-4), f"output mismatch (dt={dt})"
        assert jnp.allclose(h_final, h_ref, atol=1e-4, rtol=1e-4), f"hidden mismatch (dt={dt})"

    print("KERNEL_OK")
</pallas_src>

<mosaic_0001>
module attributes {stable_mosaic.version = 11 : i64} {
  func.func @_ctrnn_recurrence_kernel(%arg0: i32, %arg1: memref<8x8x128xf32, #tpu.memory_space<vmem>>, %arg2: memref<128x128xf32, #tpu.memory_space<any>>, %arg3: memref<8x8x128xf32, #tpu.memory_space<vmem>>, %arg4: memref<128x128xf32, #tpu.memory_space<vmem>>, %arg5: memref<8x128xf32, #tpu.memory_space<vmem>>, %arg6: memref<!tpu.dma_semaphore, #tpu.memory_space<semaphore_mem>>) attributes {dimension_semantics = [#tpu.dimension_semantics<arbitrary>], iteration_bounds = array<i64: 1>, scalar_prefetch = 0 : i64, scratch_operands = 3 : i64, tpu.core_type = #tpu.core_type<tc>, window_params = [{transform_indices = @transform_0, window_bounds = array<i64: 8, 8, 128>}, {}, {transform_indices = @transform_2, window_bounds = array<i64: 8, 8, 128>}]} {
    %c0_i32 = arith.constant 0 : i32
    %0 = arith.cmpi eq, %arg0, %c0_i32 : i32
    %1 = arith.extui %0 : i1 to i32
    %c0_i32_0 = arith.constant 0 : i32
    %2 = arith.cmpi ne, %1, %c0_i32_0 : i32
    scf.if %2 {
      tpu.enqueue_dma source(%arg2 : memref<128x128xf32, #tpu.memory_space<any>>) target(%arg4 : memref<128x128xf32, #tpu.memory_space<vmem>>) target_semaphore(%arg6 : memref<!tpu.dma_semaphore, #tpu.memory_space<semaphore_mem>>)
      tpu.wait_dma2 semaphore(%arg6 : memref<!tpu.dma_semaphore, #tpu.memory_space<semaphore_mem>>) src(%arg2 : memref<128x128xf32, #tpu.memory_space<any>>) dst(%arg4 : memref<128x128xf32, #tpu.memory_space<vmem>>)
      %cst_54 = arith.constant 0.000000e+00 : f32
      %94 = vector.broadcast %cst_54 : f32 to vector<8x128xf32>
      %c0_55 = arith.constant 0 : index
      %c0_56 = arith.constant 0 : index
      %95 = vector.load %arg5[%c0_55, %c0_56] : memref<8x128xf32, #tpu.memory_space<vmem>>, vector<8x128xf32>
      tpu.vector_store %arg5[%c0_55, %c0_56], %94 {strides = array<i32>} : memref<8x128xf32, #tpu.memory_space<vmem>>, vector<8x128xf32>,
    } else {
    }
    %c0 = arith.constant 0 : index
    %c0_1 = arith.constant 0 : index
    %3 = vector.load %arg4[%c0, %c0_1] : memref<128x128xf32, #tpu.memory_space<vmem>>, vector<128x128xf32>
    %c0_2 = arith.constant 0 : index
    %c0_3 = arith.constant 0 : index
    %4 = vector.load %arg5[%c0_2, %c0_3] : memref<8x128xf32, #tpu.memory_space<vmem>>, vector<8x128xf32>
    %c0_i32_4 = arith.constant 0 : i32
    %5 = arith.index_cast %c0_i32_4 : i32 to index
    %c0_5 = arith.constant 0 : index
    %c0_6 = arith.constant 0 : index
    %6 = vector.load %arg1[%5, %c0_5, %c0_6] : memref<8x8x128xf32, #tpu.memory_space<vmem>>, vector<1x8x128xf32>
    %7 = vector.shape_cast %6 : vector<1x8x128xf32> to vector<8x128xf32>
    %cst = arith.constant dense<0.000000e+00> : vector<8x128xf32>
    %8 = tpu.matmul %4, %3, %cst {dimension_numbers = #tpu.dot_dimension_numbers<[1], [0], [0], [1], [0, 0, 1, 1], [], []>} : vector<8x128xf32>, vector<128x128xf32>, vector<8x128xf32> -> vector<8x128xf32>
    %9 = arith.addf %7, %8 : vector<8x128xf32>
    %cst_7 = arith.constant 0.000000e+00 : f32
    %10 = vector.broadcast %cst_7 : f32 to vector<8x128xf32>
    %11 = arith.maximumf %9, %10 : vector<8x128xf32>
    %12 = arith.index_cast %c0_i32_4 : i32 to index
    %c0_8 = arith.constant 0 : index
    %c0_9 = arith.constant 0 : index
    %13 = vector.load %arg3[%12, %c0_8, %c0_9] : memref<8x8x128xf32, #tpu.memory_space<vmem>>, vector<1x8x128xf32>
    %14 = vector.shape_cast %13 : vector<1x8x128xf32> to vector<8x128xf32>
    %15 = vector.shape_cast %11 : vector<8x128xf32> to vector<1x8x128xf32>
    tpu.vector_store %arg3[%12, %c0_8, %c0_9], %15 {strides = array<i32>} : memref<8x8x128xf32, #tpu.memory_space<vmem>>, vector<1x8x128xf32>,
    %c1_i32 = arith.constant 1 : i32
    %16 = arith.index_cast %c1_i32 : i32 to index
    %c0_10 = arith.constant 0 : index
    %c0_11 = arith.constant 0 : index
    %17 = vector.load %arg1[%16, %c0_10, %c0_11] : memref<8x8x128xf32, #tpu.memory_space<vmem>>, vector<1x8x128xf32>
    %18 = vector.shape_cast %17 : vector<1x8x128xf32> to vector<8x128xf32>
    %cst_12 = arith.constant dense<0.000000e+00> : vector<8x128xf32>
    %19 = tpu.matmul %11, %3, %cst_12 {dimension_numbers = #tpu.dot_dimension_numbers<[1], [0], [0], [1], [0, 0, 1, 1], [], []>} : vector<8x128xf32>, vector<128x128xf32>, vector<8x128xf32> -> vector<8x128xf32>
    %20 = arith.addf %18, %19 : vector<8x128xf32>
    %cst_13 = arith.constant 0.000000e+00 : f32
    %21 = vector.broadcast %cst_13 : f32 to vector<8x128xf32>
    %22 = arith.maximumf %20, %21 : vector<8x128xf32>
    %23 = arith.index_cast %c1_i32 : i32 to index
    %c0_14 = arith.constant 0 : index
    %c0_15 = arith.constant 0 : index
    %24 = vector.load %arg3[%23, %c0_14, %c0_15] : memref<8x8x128xf32, #tpu.memory_space<vmem>>, vector<1x8x128xf32>
    %25 = vector.shape_cast %24 : vector<1x8x128xf32> to vector<8x128xf32>
    %26 = vector.shape_cast %22 : vector<8x128xf32> to vector<1x8x128xf32>
    tpu.vector_store %arg3[%23, %c0_14, %c0_15], %26 {strides = array<i32>} : memref<8x8x128xf32, #tpu.memory_space<vmem>>, vector<1x8x128xf32>,
    %c2_i32 = arith.constant 2 : i32
    %27 = arith.index_cast %c2_i32 : i32 to index
    %c0_16 = arith.constant 0 : index
    %c0_17 = arith.constant 0 : index
    %28 = vector.load %arg1[%27, %c0_16, %c0_17] : memref<8x8x128xf32, #tpu.memory_space<vmem>>, vector<1x8x128xf32>
    %29 = vector.shape_cast %28 : vector<1x8x128xf32> to vector<8x128xf32>
    %cst_18 = arith.constant dense<0.000000e+00> : vector<8x128xf32>
    %30 = tpu.matmul %22, %3, %cst_18 {dimension_numbers = #tpu.dot_dimension_numbers<[1], [0], [0], [1], [0, 0, 1, 1], [], []>} : vector<8x128xf32>, vector<128x128xf32>, vector<8x128xf32> -> vector<8x128xf32>
    %31 = arith.addf %29, %30 : vector<8x128xf32>
    %cst_19 = arith.constant 0.000000e+00 : f32
    %32 = vector.broadcast %cst_19 : f32 to vector<8x128xf32>
    %33 = arith.maximumf %31, %32 : vector<8x128xf32>
    %34 = arith.index_cast %c2_i32 : i32 to index
    %c0_20 = arith.constant 0 : index
    %c0_21 = arith.constant 0 : index
    %35 = vector.load %arg3[%34, %c0_20, %c0_21] : memref<8x8x128xf32, #tpu.memory_space<vmem>>, vector<1x8x128xf32>
    %36 = vector.shape_cast %35 : vector<1x8x128xf32> to vector<8x128xf32>
    %37 = vector.shape_cast %33 : vector<8x128xf32> to vector<1x8x128xf32>
    tpu.vector_store %arg3[%34, %c0_20, %c0_21], %37 {strides = array<i32>} : memref<8x8x128xf32, #tpu.memory_space<vmem>>, vector<1x8x128xf32>,
    %c3_i32 = arith.constant 3 : i32
    %38 = arith.index_cast %c3_i32 : i32 to index
    %c0_22 = arith.constant 0 : index
    %c0_23 = arith.constant 0 : index
    %39 = vector.load %arg1[%38, %c0_22, %c0_23] : memref<8x8x128xf32, #tpu.memory_space<vmem>>, vector<1x8x128xf32>
    %40 = vector.shape_cast %39 : vector<1x8x128xf32> to vector<8x128xf32>
    %cst_24 = arith.constant dense<0.000000e+00> : vector<8x128xf32>
    %41 = tpu.matmul %33, %3, %cst_24 {dimension_numbers = #tpu.dot_dimension_numbers<[1], [0], [0], [1], [0, 0, 1, 1], [], []>} : vector<8x128xf32>, vector<128x128xf32>, vector<8x128xf32> -> vector<8x128xf32>
    %42 = arith.addf %40, %41 : vector<8x128xf32>
    %cst_25 = arith.constant 0.000000e+00 : f32
    %43 = vector.broadcast %cst_25 : f32 to vector<8x128xf32>
    %44 = arith.maximumf %42, %43 : vector<8x128xf32>
    %45 = arith.index_cast %c3_i32 : i32 to index
    %c0_26 = arith.constant 0 : index
    %c0_27 = arith.constant 0 : index
    %46 = vector.load %arg3[%45, %c0_26, %c0_27] : memref<8x8x128xf32, #tpu.memory_space<vmem>>, vector<1x8x128xf32>
    %47 = vector.shape_cast %46 : vector<1x8x128xf32> to vector<8x128xf32>
    %48 = vector.shape_cast %44 : vector<8x128xf32> to vector<1x8x128xf32>
    tpu.vector_store %arg3[%45, %c0_26, %c0_27], %48 {strides = array<i32>} : memref<8x8x128xf32, #tpu.memory_space<vmem>>, vector<1x8x128xf32>,
    %c4_i32 = arith.constant 4 : i32
    %49 = arith.index_cast %c4_i32 : i32 to index
    %c0_28 = arith.constant 0 : index
    %c0_29 = arith.constant 0 : index
    %50 = vector.load %arg1[%49, %c0_28, %c0_29] : memref<8x8x128xf32, #tpu.memory_space<vmem>>, vector<1x8x128xf32>
    %51 = vector.shape_cast %50 : vector<1x8x128xf32> to vector<8x128xf32>
    %cst_30 = arith.constant dense<0.000000e+00> : vector<8x128xf32>
    %52 = tpu.matmul %44, %3, %cst_30 {dimension_numbers = #tpu.dot_dimension_numbers<[1], [0], [0], [1], [0, 0, 1, 1], [], []>} : vector<8x128xf32>, vector<128x128xf32>, vector<8x128xf32> -> vector<8x128xf32>
    %53 = arith.addf %51, %52 : vector<8x128xf32>
    %cst_31 = arith.constant 0.000000e+00 : f32
    %54 = vector.broadcast %cst_31 : f32 to vector<8x128xf32>
    %55 = arith.maximumf %53, %54 : vector<8x128xf32>
    %56 = arith.index_cast %c4_i32 : i32 to index
    %c0_32 = arith.constant 0 : index
    %c0_33 = arith.constant 0 : index
    %57 = vector.load %arg3[%56, %c0_32, %c0_33] : memref<8x8x128xf32, #tpu.memory_space<vmem>>, vector<1x8x128xf32>
    %58 = vector.shape_cast %57 : vector<1x8x128xf32> to vector<8x128xf32>
    %59 = vector.shape_cast %55 : vector<8x128xf32> to vector<1x8x128xf32>
    tpu.vector_store %arg3[%56, %c0_32, %c0_33], %59 {strides = array<i32>} : memref<8x8x128xf32, #tpu.memory_space<vmem>>, vector<1x8x128xf32>,
    %c5_i32 = arith.constant 5 : i32
    %60 = arith.index_cast %c5_i32 : i32 to index
    %c0_34 = arith.constant 0 : index
    %c0_35 = arith.constant 0 : index
    %61 = vector.load %arg1[%60, %c0_34, %c0_35] : memref<8x8x128xf32, #tpu.memory_space<vmem>>, vector<1x8x128xf32>
    %62 = vector.shape_cast %61 : vector<1x8x128xf32> to vector<8x128xf32>
    %cst_36 = arith.constant dense<0.000000e+00> : vector<8x128xf32>
    %63 = tpu.matmul %55, %3, %cst_36 {dimension_numbers = #tpu.dot_dimension_numbers<[1], [0], [0], [1], [0, 0, 1, 1], [], []>} : vector<8x128xf32>, vector<128x128xf32>, vector<8x128xf32> -> vector<8x128xf32>
    %64 = arith.addf %62, %63 : vector<8x128xf32>
    %cst_37 = arith.constant 0.000000e+00 : f32
    %65 = vector.broadcast %cst_37 : f32 to vector<8x128xf32>
    %66 = arith.maximumf %64, %65 : vector<8x128xf32>
    %67 = arith.index_cast %c5_i32 : i32 to index
    %c0_38 = arith.constant 0 : index
    %c0_39 = arith.constant 0 : index
    %68 = vector.load %arg3[%67, %c0_38, %c0_39] : memref<8x8x128xf32, #tpu.memory_space<vmem>>, vector<1x8x128xf32>
    %69 = vector.shape_cast %68 : vector<1x8x128xf32> to vector<8x128xf32>
    %70 = vector.shape_cast %66 : vector<8x128xf32> to vector<1x8x128xf32>
    tpu.vector_store %arg3[%67, %c0_38, %c0_39], %70 {strides = array<i32>} : memref<8x8x128xf32, #tpu.memory_space<vmem>>, vector<1x8x128xf32>,
    %c6_i32 = arith.constant 6 : i32
    %71 = arith.index_cast %c6_i32 : i32 to index
    %c0_40 = arith.constant 0 : index
    %c0_41 = arith.constant 0 : index
    %72 = vector.load %arg1[%71, %c0_40, %c0_41] : memref<8x8x128xf32, #tpu.memory_space<vmem>>, vector<1x8x128xf32>
    %73 = vector.shape_cast %72 : vector<1x8x128xf32> to vector<8x128xf32>
    %cst_42 = arith.constant dense<0.000000e+00> : vector<8x128xf32>
    %74 = tpu.matmul %66, %3, %cst_42 {dimension_numbers = #tpu.dot_dimension_numbers<[1], [0], [0], [1], [0, 0, 1, 1], [], []>} : vector<8x128xf32>, vector<128x128xf32>, vector<8x128xf32> -> vector<8x128xf32>
    %75 = arith.addf %73, %74 : vector<8x128xf32>
    %cst_43 = arith.constant 0.000000e+00 : f32
    %76 = vector.broadcast %cst_43 : f32 to vector<8x128xf32>
    %77 = arith.maximumf %75, %76 : vector<8x128xf32>
    %78 = arith.index_cast %c6_i32 : i32 to index
    %c0_44 = arith.constant 0 : index
    %c0_45 = arith.constant 0 : index
    %79 = vector.load %arg3[%78, %c0_44, %c0_45] : memref<8x8x128xf32, #tpu.memory_space<vmem>>, vector<1x8x128xf32>
    %80 = vector.shape_cast %79 : vector<1x8x128xf32> to vector<8x128xf32>
    %81 = vector.shape_cast %77 : vector<8x128xf32> to vector<1x8x128xf32>
    tpu.vector_store %arg3[%78, %c0_44, %c0_45], %81 {strides = array<i32>} : memref<8x8x128xf32, #tpu.memory_space<vmem>>, vector<1x8x128xf32>,
    %c7_i32 = arith.constant 7 : i32
    %82 = arith.index_cast %c7_i32 : i32 to index
    %c0_46 = arith.constant 0 : index
    %c0_47 = arith.constant 0 : index
    %83 = vector.load %arg1[%82, %c0_46, %c0_47] : memref<8x8x128xf32, #tpu.memory_space<vmem>>, vector<1x8x128xf32>
    %84 = vector.shape_cast %83 : vector<1x8x128xf32> to vector<8x128xf32>
    %cst_48 = arith.constant dense<0.000000e+00> : vector<8x128xf32>
    %85 = tpu.matmul %77, %3, %cst_48 {dimension_numbers = #tpu.dot_dimension_numbers<[1], [0], [0], [1], [0, 0, 1, 1], [], []>} : vector<8x128xf32>, vector<128x128xf32>, vector<8x128xf32> -> vector<8x128xf32>
    %86 = arith.addf %84, %85 : vector<8x128xf32>
    %cst_49 = arith.constant 0.000000e+00 : f32
    %87 = vector.broadcast %cst_49 : f32 to vector<8x128xf32>
    %88 = arith.maximumf %86, %87 : vector<8x128xf32>
    %89 = arith.index_cast %c7_i32 : i32 to index
    %c0_50 = arith.constant 0 : index
    %c0_51 = arith.constant 0 : index
    %90 = vector.load %arg3[%89, %c0_50, %c0_51] : memref<8x8x128xf32, #tpu.memory_space<vmem>>, vector<1x8x128xf32>
    %91 = vector.shape_cast %90 : vector<1x8x128xf32> to vector<8x128xf32>
    %92 = vector.shape_cast %88 : vector<8x128xf32> to vector<1x8x128xf32>
    tpu.vector_store %arg3[%89, %c0_50, %c0_51], %92 {strides = array<i32>} : memref<8x8x128xf32, #tpu.memory_space<vmem>>, vector<1x8x128xf32>,
    %c8_i32 = arith.constant 8 : i32
    %c0_52 = arith.constant 0 : index
    %c0_53 = arith.constant 0 : index
    %93 = vector.load %arg5[%c0_52, %c0_53] : memref<8x128xf32, #tpu.memory_space<vmem>>, vector<8x128xf32>
    tpu.vector_store %arg5[%c0_52, %c0_53], %88 {strides = array<i32>} : memref<8x128xf32, #tpu.memory_space<vmem>>, vector<8x128xf32>,
    return
  }
  func.func @transform_0(%arg0: i32) -> (i32, i32, i32) {
    %c0_i32 = arith.constant 0 : i32
    %c0_i32_0 = arith.constant 0 : i32
    %c0_i32_1 = arith.constant 0 : i32
    return %arg0, %c0_i32, %c0_i32_0 : i32, i32, i32
  }
  func.func @transform_2(%arg0: i32) -> (i32, i32, i32) {
    %c0_i32 = arith.constant 0 : i32
    %c0_i32_0 = arith.constant 0 : i32
    %c0_i32_1 = arith.constant 0 : i32
    return %arg0, %c0_i32, %c0_i32_0 : i32, i32, i32
  }
}

</mosaic_0001>

<bundles_post_ra>
// kernel: tpu_custom_call.1
= control target key start
LH: loop header
LB: loop body
LE: loop exit
PB: predicated region body
PF: predicated region fallthrough
CT: control target
= control target key end

     0   :  { %7 = vsyncpa [#allocation6], 0  ;;  %s1605_s0 = inlined_call_operand.hbm [shape: f32[8,8,128], index: 0, kind: input, shape index: {}]   ;;  %s1606_s1 = inlined_call_operand.hbm [shape: f32[128,128], index: 1, kind: input, shape index: {}]   ;;  %s1607_s2 = inlined_call_operand.hbm [shape: f32[8,8,128], index: 2, kind: output, shape index: {}]  }
   0x1   :  { %8 = vsyncpa [#allocation7], 0  ;;  %s1379_s9 = smov [#allocation5]   ;;  %s1307_s13 = scalar_lea.hbm %s1605_s0, 1024 }
   0x2   :  { %s14_s10 = sshll.u32 %s1379_s9, 4  ;;  %p1308_p0 = scmp.ne.s32.totalorder %s1605_s0, %s1307_s13  ;;  %s15_s10 = int_to_ptr.vmem [resolvable:$true] %s14_s10 }
   0x3   :  { %p1311_p1 = scmp.lt.u32.totalorder %s1307_s13, %s1605_s0 }
   0x5   :  { %p1313_p2 = pnand %p1311_p1, %p1308_p0 }
   0x7   :  { %1316 = shalt.err (!%p1313_p2)
}
   0x8   :  { %s1317_s18 = scalar_lea.vmem %s15_s10, 1024  ;;  %p1322_p4 = scmp.lt.s32.totalorder %s15_s10, %s15_s10 }
   0x9   :  { %p1318_p3 = scmp.ne.s32.totalorder %s15_s10, %s1317_s18  ;;  %p1323_p5 = scmp.lt.s32.totalorder %s1317_s18, %s1317_s18 }
   0xb   :  { %p1324_p6 = por %p1323_p5, %p1322_p4 }
   0xd   :  { %p1325_p7 = pnand %p1324_p6, %p1318_p3 }
   0xf   :  { %1328 = shalt.err (!%p1325_p7)
}
  0x10   :  { %s1380_s19 = smov 128   ;;  %s1381_s20 = smov 8  }
  0x11   :  { %20 = dma.hbm_to_vmem [thread:$0]  %s1605_s0, 1024, %s15_s10, [#allocation6], %s1380_s19, %s1380_s19, %s1381_s20  }
  0x12   :  { %1373 = dma.done.wait [#allocation6], 1024  }
  0x13   :  { %1374 = vsyncadd [#allocation6], 4294966272  ;;  %s1382_s23 = smov [#allocation2]   ;;  %s1329_s27 = scalar_lea.hbm %s1606_s1, 2048 }
  0x14   :  { %s35_s24 = sshll.u32 %s1382_s23, 4  ;;  %p1330_p8 = scmp.ne.s32.totalorder %s1606_s1, %s1329_s27  ;;  %s36_s24 = int_to_ptr.vmem [resolvable:$true] %s35_s24 }
  0x15   :  { %p1333_p9 = scmp.lt.u32.totalorder %s1329_s27, %s1606_s1 }
  0x17   :  { %p1335_p10 = pnand %p1333_p9, %p1330_p8 }
  0x19   :  { %1338 = shalt.err (!%p1335_p10)  }
  0x1a   :  { %s1339_s0 = scalar_lea.vmem %s36_s24, 2048  ;;  %p1344_p12 = scmp.lt.s32.totalorder %s36_s24, %s36_s24 }
  0x1b   :  { %p1340_p11 = scmp.ne.s32.totalorder %s36_s24, %s1339_s0  ;;  %p1345_p13 = scmp.lt.s32.totalorder %s1339_s0, %s1339_s0 }
  0x1d   :  { %p1346_p0 = por %p1345_p13, %p1344_p12 }
  0x1f   :  { %p1347_p1 = pnand %p1346_p0, %p1340_p11 }
  0x21   :  { %1350 = shalt.err (!%p1347_p1)  }
  0x22   :  { %38 = dma.hbm_to_vmem [thread:$0]  %s1606_s1, 2048, %s36_s24, [#allocation4] }
  0x23   :  { %1375 = dma.done.wait [#allocation4], 2048 }
  0x24   :  { %1376 = vsyncadd [#allocation4], 4294965248  ;;  %v1383_v0 = vmov 0.0|0.0   ;;  %vm1384_vm0 = vmmov 0   ;;  %v1385_v1 = vmov 0.0   ;;  %v43_v2 = vld [vmem:[#allocation2] sm:$0xff] }
  0x25   :  { %1107 = vmatprep.subr.bf16.mxu0 %v1383_v0  ;;  %859 = vmatprep.mubr.msk.f32.mxu0 %vm1384_vm0, %v1385_v1  ;;  %v44_v3 = vld [vmem:[#allocation2 + $0x8] sm:$0xff]  ;;  %v45_v4 = vld [vmem:[#allocation2 + $0x10] sm:$0xff]  ;;  %v46_v6 = vld [vmem:[#allocation2 + $0x18] sm:$0xff]  ;;  %s1386_s1 = smov [#allocation8]  }
  0x26   :  { %1131 = vmatprep.subr.bf16.mxu1 %v1383_v0  ;;  %894 = vmatprep.mubr.msk.f32.mxu1 %vm1384_vm0, %v1385_v1  ;;  %v1435_v5 = vpack.c.bf16 %v44_v3, %v43_v2  ;;  %v1438_v7 = vpack.c.bf16 %v46_v6, %v45_v4  ;;  %v47_v8 = vld [vmem:[#allocation2 + $0x20] sm:$0xff]  ;;  %v48_v9 = vld [vmem:[#allocation2 + $0x28] sm:$0xff]  ;;  %v49_v11 = vld [vmem:[#allocation2 + $0x30] sm:$0xff]  ;;  %s672_s6 = sshll.u32 %s1386_s1, 4  ;;  %s673_s6 = int_to_ptr.vmem [resolvable:$true] %s672_s6 }
  0x27   :  { %v1444_v10 = vpack.c.bf16 %v48_v9, %v47_v8  ;;  %v50_v12 = vld [vmem:[#allocation2 + $0x38] sm:$0xff]  ;;  %v51_v14 = vld [vmem:[#allocation2 + $0x40] sm:$0xff]  ;;  %v52_v15 = vld [vmem:[#allocation2 + $0x48] sm:$0xff]  ;;  %s1351_s7 = scalar_lea.vmem %s673_s6, 1024  ;;  %p1356_p3 = scmp.lt.s32.totalorder %s673_s6, %s673_s6 }
  0x28   :  { %1109 = vmatpush3.bf16.msra.mxu0 %v1435_v5  ;;  %1133 = vmatpush3.bf16.msra.mxu1 %v1435_v5  ;;  %v1450_v13 = vpack.c.bf16 %v50_v12, %v49_v11  ;;  %v1456_v16 = vpack.c.bf16 %v52_v15, %v51_v14  ;;  %v53_v17 = vld [vmem:[#allocation2 + $0x50] sm:$0xff]  ;;  %v54_v18 = vld [vmem:[#allocation2 + $0x58] sm:$0xff]  ;;  %v55_v20 = vld [vmem:[#allocation2 + $0x60] sm:$0xff]  ;;  %p1352_p2 = scmp.ne.s32.totalorder %s673_s6, %s1351_s7  ;;  %p1357_p4 = scmp.lt.s32.totalorder %s1351_s7, %s1351_s7 }
  0x29   :  { %1110 = vmatprep.subr.bf16.mxu0 %v1383_v0  ;;  %1134 = vmatprep.subr.bf16.mxu1 %v1383_v0  ;;  %v1462_v19 = vpack.c.bf16 %v54_v18, %v53_v17  ;;  %v56_v21 = vld [vmem:[#allocation2 + $0x68] sm:$0xff]  ;;  %v57_v23 = vld [vmem:[#allocation2 + $0x70] sm:$0xff]  ;;  %v58_v24 = vld [vmem:[#allocation2 + $0x78] sm:$0xff] }
  0x2a   :  { %v1468_v22 = vpack.c.bf16 %v56_v21, %v55_v20  ;;  %v1474_v25 = vpack.c.bf16 %v58_v24, %v57_v23  ;;  %v60_v26 = vld [vmem:[#allocation5] sm:$0xff]  ;;  %v135_v31 = vld [vmem:[#allocation5 + $0x8] sm:$0xff]  ;;  %v211_v36 = vld [vmem:[#allocation5 + $0x10] sm:$0xff]  ;;  %p1358_p5 = por %p1357_p4, %p1356_p3 }
  0x2b   :  { %v287_v41 = vld [vmem:[#allocation5 + $0x18] sm:$0xff]  ;;  %v363_v46 = vld [vmem:[#allocation5 + $0x20] sm:$0xff]  ;;  %v439_v51 = vld [vmem:[#allocation5 + $0x28] sm:$0xff] }
  0x2c   :  { %1112 = vmatpush3.bf16.msra.mxu0 %v1438_v7  ;;  %1136 = vmatpush3.bf16.msra.mxu1 %v1438_v7  ;;  %v515_v56 = vld [vmem:[#allocation5 + $0x30] sm:$0xff]  ;;  %v591_v61 = vld [vmem:[#allocation5 + $0x38] sm:$0xff]  ;;  %p1359_p6 = pnand %p1358_p5, %p1352_p2 }
  0x2d   :  { %1113 = vmatprep.subr.bf16.mxu0 %v1383_v0  ;;  %1137 = vmatprep.subr.bf16.mxu1 %v1383_v0 }
  0x30   :  { %1115 = vmatpush3.bf16.msra.mxu0 %v1444_v10  ;;  %1139 = vmatpush3.bf16.msra.mxu1 %v1444_v10 }
  0x31   :  { %1116 = vmatprep.subr.bf16.mxu0 %v1383_v0  ;;  %1140 = vmatprep.subr.bf16.mxu1 %v1383_v0 }
  0x34   :  { %1118 = vmatpush3.bf16.msra.mxu0 %v1450_v13  ;;  %1142 = vmatpush3.bf16.msra.mxu1 %v1450_v13 }
  0x35   :  { %1119 = vmatprep.subr.bf16.mxu0 %v1383_v0  ;;  %1143 = vmatprep.subr.bf16.mxu1 %v1383_v0 }
  0x38   :  { %1121 = vmatpush3.bf16.msra.mxu0 %v1456_v16  ;;  %1145 = vmatpush3.bf16.msra.mxu1 %v1456_v16 }
  0x39   :  { %1122 = vmatprep.subr.bf16.mxu0 %v1383_v0  ;;  %1146 = vmatprep.subr.bf16.mxu1 %v1383_v0 }
  0x3c   :  { %1124 = vmatpush3.bf16.msra.mxu0 %v1462_v19  ;;  %1148 = vmatpush3.bf16.msra.mxu1 %v1462_v19 }
  0x3d   :  { %1125 = vmatprep.subr.bf16.mxu0 %v1383_v0  ;;  %1149 = vmatprep.subr.bf16.mxu1 %v1383_v0 }
  0x40   :  { %1127 = vmatpush3.bf16.msra.mxu0 %v1468_v22  ;;  %1151 = vmatpush3.bf16.msra.mxu1 %v1468_v22 }
  0x41   :  { %1128 = vmatprep.subr.bf16.mxu0 %v1383_v0  ;;  %1152 = vmatprep.subr.bf16.mxu1 %v1383_v0 }
  0x44   :  { %1130 = vmatpush3.bf16.msra.mxu0 %v1474_v25  ;;  %1154 = vmatpush3.bf16.msra.mxu1 %v1474_v25 }
  0x45   :  { %1155 = vmatprep.subr.bf16.mxu0 %v1383_v0  ;;  %1179 = vmatprep.subr.bf16.mxu1 %v1383_v0 }
  0x47   :  { %860 = vmatmul.mubr.f32.vlgmr.msra.gmra.mrb[0].mxu0 %v1385_v1 }
  0x48   :  { %1157 = vmatpush3.bf16.msra.mxu0 %v1435_v5  ;;  %929 = vmatprep.mubr.msk.f32.mxu0 %vm1384_vm0, %v1385_v1 }
  0x49   :  { %1158 = vmatprep.subr.bf16.mxu0 %v1383_v0 }
  0x4c   :  { %1160 = vmatpush3.bf16.msra.mxu0 %v1438_v7 }
  0x4d   :  { %1161 = vmatprep.subr.bf16.mxu0 %v1383_v0 }
  0x50   :  { %1163 = vmatpush3.bf16.msra.mxu0 %v1444_v10 }
  0x51   :  { %1164 = vmatprep.subr.bf16.mxu0 %v1383_v0 }
  0x54   :  { %1166 = vmatpush3.bf16.msra.mxu0 %v1450_v13 }
  0x55   :  { %1167 = vmatprep.subr.bf16.mxu0 %v1383_v0 }
  0x58   :  { %1169 = vmatpush3.bf16.msra.mxu0 %v1456_v16 }
  0x59   :  { %1170 = vmatprep.subr.bf16.mxu0 %v1383_v0 }
  0x5c   :  { %1172 = vmatpush3.bf16.msra.mxu0 %v1462_v19 }
  0x5d   :  { %1173 = vmatprep.subr.bf16.mxu0 %v1383_v0 }
  0x60   :  { %1175 = vmatpush3.bf16.msra.mxu0 %v1468_v22 }
  0x61   :  { %1176 = vmatprep.subr.bf16.mxu0 %v1383_v0 }
  0x64   :  { %1178 = vmatpush3.bf16.msra.mxu0 %v1474_v25 }
  0x65   :  { %1203 = vmatprep.subr.bf16.mxu0 %v1383_v0 }
 0x11a   :  { %v127_v27 = vpop.f32.mrb[0].mxu0 }
 0x11b   :  { %v131_v28 = vadd.f32 %v127_v27, %v60_v26  ;;  %v861_v29 = vpop.f32.mrb[1].mxu0 }
 0x11d   :  { %v132_v30 = vmax.f32 %v131_v28, 0.0 }
 0x11f   :  { %133 = vst [vmem:[#allocation8] sm:$0xff] %v132_v30  ;;  %895 = vmatmul.mubr.f32.vlgmr.msra.gmra.mrb[0].mxu1 %v132_v30 }
 0x120   :  { %1181 = vmatpush3.bf16.msra.mxu1 %v1435_v5  ;;  %964 = vmatprep.mubr.msk.f32.mxu1 %vm1384_vm0, %v1385_v1 }
 0x121   :  { %1182 = vmatprep.subr.bf16.mxu1 %v1383_v0 }
 0x124   :  { %1184 = vmatpush3.bf16.msra.mxu1 %v1438_v7 }
 0x125   :  { %1185 = vmatprep.subr.bf16.mxu1 %v1383_v0 }
 0x128   :  { %1187 = vmatpush3.bf16.msra.mxu1 %v1444_v10 }
 0x129   :  { %1188 = vmatprep.subr.bf16.mxu1 %v1383_v0 }
 0x12c   :  { %1190 = vmatpush3.bf16.msra.mxu1 %v1450_v13 }
 0x12d   :  { %1191 = vmatprep.subr.bf16.mxu1 %v1383_v0 }
 0x130   :  { %1193 = vmatpush3.bf16.msra.mxu1 %v1456_v16 }
 0x131   :  { %1194 = vmatprep.subr.bf16.mxu1 %v1383_v0 }
 0x134   :  { %1196 = vmatpush3.bf16.msra.mxu1 %v1462_v19 }
 0x135   :  { %1197 = vmatprep.subr.bf16.mxu1 %v1383_v0 }
 0x138   :  { %1199 = vmatpush3.bf16.msra.mxu1 %v1468_v22 }
 0x139   :  { %1200 = vmatprep.subr.bf16.mxu1 %v1383_v0 }
 0x13c   :  { %1202 = vmatpush3.bf16.msra.mxu1 %v1474_v25 }
 0x13d   :  { %1227 = vmatprep.subr.bf16.mxu1 %v1383_v0 }
 0x1f2   :  { %v202_v32 = vpop.f32.mrb[0].mxu1 }
 0x1f3   :  { %v206_v33 = vadd.f32 %v202_v32, %v135_v31  ;;  %v896_v34 = vpop.f32.mrb[1].mxu1 }
 0x1f5   :  { %v207_v35 = vmax.f32 %v206_v33, 0.0 }
 0x1f7   :  { %209 = vst [vmem:[#allocation8 + $0x8] sm:$0xff] %v207_v35  ;;  %930 = vmatmul.mubr.f32.vlgmr.msra.gmra.mrb[2].mxu0 %v207_v35 }
 0x1f8   :  { %1205 = vmatpush3.bf16.msra.mxu0 %v1435_v5  ;;  %999 = vmatprep.mubr.msk.f32.mxu0 %vm1384_vm0, %v1385_v1 }
 0x1f9   :  { %1206 = vmatprep.subr.bf16.mxu0 %v1383_v0 }
 0x1fc   :  { %1208 = vmatpush3.bf16.msra.mxu0 %v1438_v7 }
 0x1fd   :  { %1209 = vmatprep.subr.bf16.mxu0 %v1383_v0 }
 0x200   :  { %1211 = vmatpush3.bf16.msra.mxu0 %v1444_v10 }
 0x201   :  { %1212 = vmatprep.subr.bf16.mxu0 %v1383_v0 }
 0x204   :  { %1214 = vmatpush3.bf16.msra.mxu0 %v1450_v13 }
 0x205   :  { %1215 = vmatprep.subr.bf16.mxu0 %v1383_v0 }
 0x208   :  { %1217 = vmatpush3.bf16.msra.mxu0 %v1456_v16 }
 0x209   :  { %1218 = vmatprep.subr.bf16.mxu0 %v1383_v0 }
 0x20c   :  { %1220 = vmatpush3.bf16.msra.mxu0 %v1462_v19 }
 0x20d   :  { %1221 = vmatprep.subr.bf16.mxu0 %v1383_v0 }
 0x210   :  { %1223 = vmatpush3.bf16.msra.mxu0 %v1468_v22 }
 0x211   :  { %1224 = vmatprep.subr.bf16.mxu0 %v1383_v0 }
 0x214   :  { %1226 = vmatpush3.bf16.msra.mxu0 %v1474_v25 }
 0x215   :  { %1251 = vmatprep.subr.bf16.mxu0 %v1383_v0 }
 0x2ca   :  { %v278_v37 = vpop.f32.mrb[2].mxu0 }
 0x2cb   :  { %v282_v38 = vadd.f32 %v278_v37, %v211_v36  ;;  %v931_v39 = vpop.f32.mrb[3].mxu0 }
 0x2cd   :  { %v283_v40 = vmax.f32 %v282_v38, 0.0 }
 0x2cf   :  { %285 = vst [vmem:[#allocation8 + $0x10] sm:$0xff] %v283_v40  ;;  %965 = vmatmul.mubr.f32.vlgmr.msra.gmra.mrb[2].mxu1 %v283_v40 }
 0x2d0   :  { %1229 = vmatpush3.bf16.msra.mxu1 %v1435_v5  ;;  %1034 = vmatprep.mubr.msk.f32.mxu1 %vm1384_vm0, %v1385_v1 }
 0x2d1   :  { %1230 = vmatprep.subr.bf16.mxu1 %v1383_v0 }
 0x2d4   :  { %1232 = vmatpush3.bf16.msra.mxu1 %v1438_v7 }
 0x2d5   :  { %1233 = vmatprep.subr.bf16.mxu1 %v1383_v0 }
 0x2d8   :  { %1235 = vmatpush3.bf16.msra.mxu1 %v1444_v10 }
 0x2d9   :  { %1236 = vmatprep.subr.bf16.mxu1 %v1383_v0 }
 0x2dc   :  { %1238 = vmatpush3.bf16.msra.mxu1 %v1450_v13 }
 0x2dd   :  { %1239 = vmatprep.subr.bf16.mxu1 %v1383_v0 }
 0x2e0   :  { %1241 = vmatpush3.bf16.msra.mxu1 %v1456_v16 }
 0x2e1   :  { %1242 = vmatprep.subr.bf16.mxu1 %v1383_v0 }
 0x2e4   :  { %1244 = vmatpush3.bf16.msra.mxu1 %v1462_v19 }
 0x2e5   :  { %1245 = vmatprep.subr.bf16.mxu1 %v1383_v0 }
 0x2e8   :  { %1247 = vmatpush3.bf16.msra.mxu1 %v1468_v22 }
 0x2e9   :  { %1248 = vmatprep.subr.bf16.mxu1 %v1383_v0 }
 0x2ec   :  { %1250 = vmatpush3.bf16.msra.mxu1 %v1474_v25 }
 0x2ed   :  { %1275 = vmatprep.subr.bf16.mxu1 %v1383_v0 }
 0x3a2   :  { %v354_v42 = vpop.f32.mrb[2].mxu1 }
 0x3a3   :  { %v358_v43 = vadd.f32 %v354_v42, %v287_v41  ;;  %v966_v44 = vpop.f32.mrb[3].mxu1 }
 0x3a5   :  { %v359_v45 = vmax.f32 %v358_v43, 0.0 }
 0x3a7   :  { %361 = vst [vmem:[#allocation8 + $0x18] sm:$0xff] %v359_v45  ;;  %1000 = vmatmul.mubr.f32.vlgmr.msra.gmra.mrb[4].mxu0 %v359_v45 }
 0x3a8   :  { %1253 = vmatpush3.bf16.msra.mxu0 %v1435_v5  ;;  %1069 = vmatprep.mubr.msk.f32.mxu0 %vm1384_vm0, %v1385_v1 }
 0x3a9   :  { %1254 = vmatprep.subr.bf16.mxu0 %v1383_v0 }
 0x3ac   :  { %1256 = vmatpush3.bf16.msra.mxu0 %v1438_v7 }
 0x3ad   :  { %1257 = vmatprep.subr.bf16.mxu0 %v1383_v0 }
 0x3b0   :  { %1259 = vmatpush3.bf16.msra.mxu0 %v1444_v10 }
 0x3b1   :  { %1260 = vmatprep.subr.bf16.mxu0 %v1383_v0 }
 0x3b4   :  { %1262 = vmatpush3.bf16.msra.mxu0 %v1450_v13 }
 0x3b5   :  { %1263 = vmatprep.subr.bf16.mxu0 %v1383_v0 }
 0x3b8   :  { %1265 = vmatpush3.bf16.msra.mxu0 %v1456_v16 }
 0x3b9   :  { %1266 = vmatprep.subr.bf16.mxu0 %v1383_v0 }
 0x3bc   :  { %1268 = vmatpush3.bf16.msra.mxu0 %v1462_v19 }
 0x3bd   :  { %1269 = vmatprep.subr.bf16.mxu0 %v1383_v0 }
 0x3c0   :  { %1271 = vmatpush3.bf16.msra.mxu0 %v1468_v22 }
 0x3c1   :  { %1272 = vmatprep.subr.bf16.mxu0 %v1383_v0 }
 0x3c4   :  { %1274 = vmatpush3.bf16.msra.mxu0 %v1474_v25 }
 0x47a   :  { %v430_v47 = vpop.f32.mrb[4].mxu0 }
 0x47b   :  { %v434_v48 = vadd.f32 %v430_v47, %v363_v46  ;;  %v1001_v49 = vpop.f32.mrb[5].mxu0 }
 0x47d   :  { %v435_v50 = vmax.f32 %v434_v48, 0.0 }
 0x47f   :  { %437 = vst [vmem:[#allocation8 + $0x20] sm:$0xff] %v435_v50  ;;  %1035 = vmatmul.mubr.f32.vlgmr.msra.gmra.mrb[4].mxu1 %v435_v50 }
 0x480   :  { %1277 = vmatpush3.bf16.msra.mxu1 %v1435_v5  ;;  %1104 = vmatprep.mubr.msk.f32.mxu1 %vm1384_vm0, %v1385_v1 }
 0x481   :  { %1278 = vmatprep.subr.bf16.mxu1 %v1383_v0 }
 0x484   :  { %1280 = vmatpush3.bf16.msra.mxu1 %v1438_v7 }
 0x485   :  { %1281 = vmatprep.subr.bf16.mxu1 %v1383_v0 }
 0x488   :  { %1283 = vmatpush3.bf16.msra.mxu1 %v1444_v10 }
 0x489   :  { %1284 = vmatprep.subr.bf16.mxu1 %v1383_v0 }
 0x48c   :  { %1286 = vmatpush3.bf16.msra.mxu1 %v1450_v13 }
 0x48d   :  { %1287 = vmatprep.subr.bf16.mxu1 %v1383_v0 }
 0x490   :  { %1289 = vmatpush3.bf16.msra.mxu1 %v1456_v16 }
 0x491   :  { %1290 = vmatprep.subr.bf16.mxu1 %v1383_v0 }
 0x494   :  { %1292 = vmatpush3.bf16.msra.mxu1 %v1462_v19 }
 0x495   :  { %1293 = vmatprep.subr.bf16.mxu1 %v1383_v0 }
 0x498   :  { %1295 = vmatpush3.bf16.msra.mxu1 %v1468_v22 }
 0x499   :  { %1296 = vmatprep.subr.bf16.mxu1 %v1383_v0 }
 0x49c   :  { %1298 = vmatpush3.bf16.msra.mxu1 %v1474_v25 }
 0x552   :  { %v506_v52 = vpop.f32.mrb[4].mxu1 }
 0x553   :  { %v510_v53 = vadd.f32 %v506_v52, %v439_v51  ;;  %v1036_v54 = vpop.f32.mrb[5].mxu1 }
 0x555   :  { %v511_v55 = vmax.f32 %v510_v53, 0.0 }
 0x557   :  { %513 = vst [vmem:[#allocation8 + $0x28] sm:$0xff] %v511_v55  ;;  %1070 = vmatmul.mubr.f32.vlgmr.msra.gmra.mrb[6].mxu0 %v511_v55 }
 0x62a   :  { %v582_v57 = vpop.f32.mrb[6].mxu0 }
 0x62b   :  { %v586_v58 = vadd.f32 %v582_v57, %v515_v56  ;;  %v1071_v59 = vpop.f32.mrb[7].mxu0 }
 0x62d   :  { %v587_v60 = vmax.f32 %v586_v58, 0.0 }
 0x62f   :  { %589 = vst [vmem:[#allocation8 + $0x30] sm:$0xff] %v587_v60  ;;  %1105 = vmatmul.mubr.f32.vlgmr.msra.gmra.mrb[6].mxu1 %v587_v60 }
 0x702   :  { %v658_v62 = vpop.f32.mrb[6].mxu1 }
 0x703   :  { %v662_v63 = vadd.f32 %v658_v62, %v591_v61  ;;  %v1106_v0 = vpop.f32.mrb[7].mxu1 }
 0x705   :  { %v663_v1 = vmax.f32 %v662_v63, 0.0 }
 0x707   :  { %665 = vst [vmem:[#allocation8 + $0x38] sm:$0xff] %v663_v1 }
 0x708   :  { %1362 = shalt.err (!%p1359_p6)
}
 0x709   :  { %s1363_s10 = scalar_lea.hbm %s1607_s2, 1024 }
 0x70a   :  { %p1364_p7 = scmp.ne.s32.totalorder %s1607_s2, %s1363_s10  ;;  %p1367_p8 = scmp.lt.u32.totalorder %s1363_s10, %s1607_s2 }
 0x70c   :  { %p1369_p9 = pnand %p1367_p8, %p1364_p7 }
 0x70e   :  { %1372 = shalt.err (!%p1369_p9)
}
 0x70f   :  { %678 = dma.vmem_to_hbm [thread:$0]  %s673_s6, 1024, %s1607_s2, [#allocation7], %s1380_s19, %s1380_s19, %s1381_s20  }
 0x710   :  { %1377 = dma.done.wait [#allocation7], 1024  }
 0x711   :  { %1378 = vsyncadd [#allocation7], 4294966272 }
 0x712   :  { %682 = vsyncpa [#allocation6], 1 }
 0x713   :  { %683 = vsyncpa [#allocation7], 1 }
 0x714   :  { %684 = vsyncmov [#allocation4] }
 0x717   :  { %s685_s17 = vpop.sfrf %684 }
 0x718   :  { %p690_p10 = scmp.ne.s32.totalorder %s685_s17, 0 }
 0x71a   :  { %689 = shalt.err (%p690_p10)  }

</bundles_post_ra>
